<compile_context>
chip_gen: v7x
topology: tpu7x:2x2x1
jax: 0.10.0
libtpu: 0.0.40
codegen_flags: <defaults>
</compile_context>

<pallas_src>
import functools

import jax
import jax.numpy as jnp
from jax import lax
from jax.experimental import pallas as pl
from jax.experimental.pallas import tpu as pltpu


def _spatial_gcn_kernel(x_ref, y_ref, wqv_ref, bqv_ref, wcat_ref, bcat_ref, out_ref,
                        *, approx_softmax=True):
    # x_ref   : (Bb, Cx, N) bf16   channels-first images (Cx = 2*plane)
    # y_ref   : (Bb, C,  N) bf16   node_k (C = plane)
    # wqv_ref : (2C, Cx)    bf16   rows [0:C)=W_v, [C:2C)=W_q
    # bqv_ref : (2C, 1)     f32    packed conv biases (b_v | b_q)
    # wcat_ref: (C, Cx+C)   bf16   [M_pre | M_dec]  (folded xpre | folded decode chain)
    # bcat_ref: (C, 1)      f32    c_pre + c_dec
    # out_ref : (Bb, C, N)  bf16   channels-first output (lane-dense, N mult of 128)
    Bb, C, N = out_ref.shape

    # Widen the batch block into one lane-dense slab (lane concat boundaries are
    # multiples of N, itself a multiple of 128 -> aligned, cheap VMEM copies).
    x_wide = (jnp.concatenate([x_ref[b] for b in range(Bb)], axis=-1)
              if Bb > 1 else x_ref[0])                                    # (Cx, Bb*N)

    # node_v / node_q in a single shared-weight MXU pass over the whole block.
    proj = jnp.dot(wqv_ref[...], x_wide,
                   preferred_element_type=jnp.float32) + bqv_ref[...]     # (2C, Bb*N)
    v_w = proj[:C].astype(jnp.bfloat16)        # cast immediately; f32 slab dies here
    q_w = proj[C:2 * C].astype(jnp.bfloat16)

    # Per-image attention (cannot be batched along lanes without mixing images).
    av2_parts = []
    for b in range(Bb):
        lo = b * N
        q_b = q_w[:, lo:lo + N]                                           # (C, N)
        v_b = v_w[:, lo:lo + N]                                           # (C, N)
        # AV[i, j] = sum_n q[i, n] * v[j, n]   (torch: bmm(node_q, node_v^T-view))
        av = lax.dot_general(q_b, v_b, (((1,), (1,)), ((), ())),
                             preferred_element_type=jnp.float32)          # (C, C)
        # Row softmax (torch dim=2).
        av = jnp.exp(av - jnp.max(av, axis=-1, keepdims=True))
        denom = jnp.sum(av, axis=-1, keepdims=True)
        if approx_softmax:
            av = av * pl.reciprocal(denom, approx=True)   # EUP slot, not a VPU divide
        else:
            av = av / denom
        # AV2[j, n] = sum_i S[i, j] * y[i, n]  (torch: bmm(node_k, S), transposed)
        av2 = lax.dot_general(av.astype(jnp.bfloat16), y_ref[b],
                              (((0,), (0,)), ((), ())),
                              preferred_element_type=jnp.float32)         # (C, N)
        av2_parts.append(av2.astype(jnp.bfloat16))
    av2_wide = (jnp.concatenate(av2_parts, axis=-1)
                if Bb > 1 else av2_parts[0])                              # (C, Bb*N)

    # Fused decode + residual branch: relu([M_pre | M_dec] @ [x ; AV2] + b).
    # x first so the sublane concat boundary (Cx = 2*plane, multiple of 16) is
    # bf16-tile aligned.
    stacked = jnp.concatenate([x_wide, av2_wide], axis=0)                 # (Cx+C, Bb*N)
    out_w = jnp.dot(wcat_ref[...], stacked,
                    preferred_element_type=jnp.float32) + bcat_ref[...]   # (C, Bb*N) f32
    out_w = jnp.maximum(out_w, 0.0).astype(out_ref.dtype)
    for b in range(Bb):
        out_ref[b] = out_w[:, b * N:(b + 1) * N]


def _pick_block_b(B, max_bb=8):
    """Largest batch block that still leaves >= 2 grid steps for DMA overlap."""
    for cand in (8, 4, 2):
        if cand <= max_bb and B % cand == 0 and B // cand >= 2:
            return cand
    return 1


def spatial_gcn_pallas(x_cf, y_cf, folded, *, block_b=None, approx_softmax=True):
    """x_cf: (B, 2*plane, N), y_cf: (B, plane, N) -> (B, plane, N) bf16, channels-first."""
    B, Cx, N = x_cf.shape
    C = y_cf.shape[1]
    if C % 8 != 0 or Cx % 16 != 0 or N % 128 != 0:
        # TODO(synk): pad C (plane) to a multiple of 8 and N=H*W to a multiple of 128
        # for arbitrary shapes; unpadded shapes force relayout copies in Mosaic.
        raise ValueError("plane must be a multiple of 8 and H*W a multiple of 128")
    Bb = block_b if block_b is not None else _pick_block_b(B)
    assert B % Bb == 0, "batch must be divisible by the batch block size"

    wqv, bqv, wcat, bcat = folded["wqv"], folded["bqv"], folded["wcat"], folded["bcat"]

    # Rough per-step VMEM estimate: double-buffered bf16 in/out blocks plus the large
    # in-kernel temporaries. Clamp to [32 MiB, 48 MiB]: 32 MiB is the scoped default
    # on v6e/v7x (and above v5e's 16 MiB); 48 MiB stays below v7x's 64 MiB physical.
    blk = Bb * N
    est = (2 * 2 * blk * (Cx + 2 * C)            # x/y/out blocks, double-buffered, bf16
           + 4 * blk * 3 * C                     # f32 proj + f32 out_w temporaries
           + 2 * blk * (2 * C + 2 * Cx + 2 * C))  # bf16 q/v, x_wide, av2_wide, stacked
    vmem_limit = int(min(max(2 * est, 32 << 20), 48 << 20))
    # TODO(synk): if `est` outgrows ~48 MiB (large plane * H*W on v7x), switch to an
    # N-tiled two-pass (accumulate AV over an "arbitrary" N axis into a (C,C) scratch,
    # softmax once, second N-tiled pass for S^T*y + fused decode).

    grid_spec = pltpu.PrefetchScalarGridSpec(
        num_scalar_prefetch=0,
        grid=(B // Bb,),
        in_specs=[
            pl.BlockSpec((Bb, Cx, N), lambda i: (i, 0, 0)),
            pl.BlockSpec((Bb, C, N), lambda i: (i, 0, 0)),
            pl.BlockSpec(wqv.shape, lambda i: (0, 0)),
            pl.BlockSpec(bqv.shape, lambda i: (0, 0)),
            pl.BlockSpec(wcat.shape, lambda i: (0, 0)),
            pl.BlockSpec(bcat.shape, lambda i: (0, 0)),
        ],
        out_specs=pl.BlockSpec((Bb, C, N), lambda i: (i, 0, 0)),
    )
    kernel = functools.partial(_spatial_gcn_kernel, approx_softmax=approx_softmax)
    return pl.pallas_call(
        kernel,
        out_shape=jax.ShapeDtypeStruct((B, C, N), jnp.bfloat16),
        grid_spec=grid_spec,
        compiler_params=pltpu.CompilerParams(
            # TODO(synk): use CORE_PARALLEL / pl.core_map on the batch-block axis for a
            # guaranteed 2-TC split on v7x; plain "parallel" kept for v5e/v6e portability.
            dimension_semantics=("parallel",),
            vmem_limit_bytes=vmem_limit),
    )(x_cf.astype(jnp.bfloat16), y_cf.astype(jnp.bfloat16), wqv, bqv, wcat, bcat)


# --------------------------- parameter handling -----------------------------

def make_params(key, plane):
    """Raw torch-style parameters matching SpatialGCN(plane).__init__ (eval mode)."""
    inter = plane // 2
    cx, c = plane * 2, plane
    keys = iter(jax.random.split(key, 32))

    def conv_w(out_c, in_c):
        return (jax.random.normal(next(keys), (out_c, in_c)) * 0.2).astype(jnp.float32)

    def bias(out_c):
        return (jax.random.normal(next(keys), (out_c,)) * 0.1).astype(jnp.float32)

    def bn(nc):
        return {
            "gamma": jax.random.uniform(next(keys), (nc,), minval=0.5, maxval=1.5),
            "beta": jax.random.normal(next(keys), (nc,)) * 0.1,
            "mean": jax.random.normal(next(keys), (nc,)) * 0.1,
            "var": jax.random.uniform(next(keys), (nc,), minval=0.5, maxval=1.5),
        }

    return {
        "w_v": conv_w(c, cx), "b_v": bias(c),                          # node_v_y
        "w_q": conv_w(c, cx), "b_q": bias(c),                          # node_q_y
        "w_wg": conv_w(inter * 2, inter * 2), "bn_wg": bn(inter * 2),  # conv_wg_decode
        "w_od": conv_w(c, inter * 2), "b_od": bias(c), "bn_od": bn(c),  # outdecode
        "w_pre1": conv_w(inter * 2, inter * 4), "b_pre1": bias(inter * 2),
        "bn_pre1": bn(inter * 2),                                      # xpre conv1+BN1
        "w_pre2": conv_w(c, inter * 2), "b_pre2": bias(c), "bn_pre2": bn(c),  # xpre 2
    }


def fold_params(p, eps=1e-5):
    """Exact algebraic folding of eval-mode BN / biases / chained 1x1 convs (in f32)."""
    def bn_ss(b):
        s = b["gamma"] / jnp.sqrt(b["var"] + eps)
        return s, b["beta"] - b["mean"] * s

    s_wg, h_wg = bn_ss(p["bn_wg"])
    s_od, h_od = bn_ss(p["bn_od"])
    s_1, h_1 = bn_ss(p["bn_pre1"])
    s_2, h_2 = bn_ss(p["bn_pre2"])

    # decode chain: diag(s_od)*W_od*diag(s_wg)*W_wg (+ folded bias)
    m_dec = (s_od[:, None] * p["w_od"]) @ (s_wg[:, None] * p["w_wg"])
    c_dec = s_od * (p["w_od"] @ h_wg + p["b_od"]) + h_od

    # xpre chain: diag(s2)*W2*diag(s1)*W1 (+ folded bias)
    m_pre = (s_2[:, None] * p["w_pre2"]) @ (s_1[:, None] * p["w_pre1"])
    c_pre = s_2 * (p["w_pre2"] @ (s_1 * p["b_pre1"] + h_1) + p["b_pre2"]) + h_2

    wqv = jnp.concatenate([p["w_v"], p["w_q"]], axis=0)                 # (2C, Cx)
    bqv = jnp.concatenate([p["b_v"], p["b_q"]], axis=0)[:, None]        # (2C, 1)
    # Fused decode + residual: out = [M_pre | M_dec] @ [x ; AV2] + (c_pre + c_dec)
    wcat = jnp.concatenate([m_pre, m_dec], axis=1)                      # (C, Cx + C)
    bcat = (c_pre + c_dec)[:, None]                                     # (C, 1)
    return {
        "wqv": wqv.astype(jnp.bfloat16),
        "bqv": bqv.astype(jnp.float32),
        "wcat": wcat.astype(jnp.bfloat16),
        "bcat": bcat.astype(jnp.float32),
    }


# ------------------------------- reference ----------------------------------

def spatial_gcn_reference(x_cf, y_cf, p, eps=1e-5):
    """Pure-JAX f32 reference using the UN-folded params (channels-first layout)."""
    def bn(z, b):
        s = b["gamma"] / jnp.sqrt(b["var"] + eps)
        return z * s[None, :, None] + (b["beta"] - b["mean"] * s)[None, :, None]

    def conv1x1(z, w, b=None):
        out = jnp.einsum("oc,bcn->bon", w, z)
        return out if b is None else out + b[None, :, None]

    node_v = conv1x1(x_cf, p["w_v"], p["b_v"])
    node_q = conv1x1(x_cf, p["w_q"], p["b_q"])
    av = jnp.einsum("bin,bjn->bij", node_q, node_v)
    av = jax.nn.softmax(av, axis=-1)
    av = jnp.einsum("bij,bin->bjn", av, y_cf)                 # node_k @ AV, transposed
    avw = bn(conv1x1(av, p["w_wg"]), p["bn_wg"])
    dec = bn(conv1x1(avw, p["w_od"], p["b_od"]), p["bn_od"])
    t = bn(conv1x1(x_cf, p["w_pre1"], p["b_pre1"]), p["bn_pre1"])
    t = bn(conv1x1(t, p["w_pre2"], p["b_pre2"]), p["bn_pre2"])
    return jnp.maximum(dec + t, 0.0)


if __name__ == "__main__":
    plane = 8
    B, H, W = 4, 16, 16            # B=4 so the batch-blocked grid has Bb=2, 2 steps
    N = H * W
    Cx, C = plane * 2, plane

    key = jax.random.PRNGKey(0)
    kx, ky, kp = jax.random.split(key, 3)

    # PyTorch-convention NCHW inputs: x is (B, 2*plane, H, W), y is (B, plane, H, W)
    x_nchw = jax.random.normal(kx, (B, Cx, H, W), dtype=jnp.float32)
    y_nchw = jax.random.normal(ky, (B, C, H, W), dtype=jnp.float32)

    # Channels-first flattened layout is a pure reshape of NCHW — no transposes.
    x_cf = x_nchw.reshape(B, Cx, N)
    y_cf = y_nchw.reshape(B, C, N)

    params = make_params(kp, plane)
    folded = fold_params(params)

    out = spatial_gcn_pallas(x_cf, y_cf, folded)
    out = jax.block_until_ready(out)

    ref = spatial_gcn_reference(x_cf, y_cf, params)
    assert out.shape == (B, C, N)
    # Intentional precision choices: bf16 MXU operands, bf16 output, approx softmax
    # reciprocal -> compare against the f32 reference with a loosened tolerance.
    max_err = float(jnp.max(jnp.abs(out.astype(jnp.float32) - ref)))
    assert max_err < 1e-1, f"mismatch vs pure-JAX reference: max abs err {max_err}"

    out_nchw = out.reshape(B, C, H, W)   # already NCHW — no transpose needed
    assert out_nchw.shape == (B, plane, H, W)

    print("KERNEL_OK")
</pallas_src>

<mosaic_0001>
module attributes {stable_mosaic.version = 11 : i64} {
  func.func @_spatial_gcn_kernel(%arg0: i32, %arg1: memref<2x16x256xbf16, #tpu.memory_space<vmem>>, %arg2: memref<2x8x256xbf16, #tpu.memory_space<vmem>>, %arg3: memref<16x16xbf16, #tpu.memory_space<vmem>>, %arg4: memref<16x1xf32, #tpu.memory_space<vmem>>, %arg5: memref<8x24xbf16, #tpu.memory_space<vmem>>, %arg6: memref<8x1xf32, #tpu.memory_space<vmem>>, %arg7: memref<2x8x256xbf16, #tpu.memory_space<vmem>>) attributes {dimension_semantics = [#tpu.dimension_semantics<parallel>], iteration_bounds = array<i64: 2>, scalar_prefetch = 0 : i64, scratch_operands = 0 : i64, tpu.core_type = #tpu.core_type<tc>, window_params = [{transform_indices = @transform_0, window_bounds = array<i64: 2, 16, 256>}, {transform_indices = @transform_1, window_bounds = array<i64: 2, 8, 256>}, {pipeline_mode = #tpu.pipeline_mode<synchronous>, transform_indices = @transform_2, window_bounds = array<i64: 16, 16>}, {pipeline_mode = #tpu.pipeline_mode<synchronous>, transform_indices = @transform_3, window_bounds = array<i64: 16, 1>}, {pipeline_mode = #tpu.pipeline_mode<synchronous>, transform_indices = @transform_4, window_bounds = array<i64: 8, 24>}, {pipeline_mode = #tpu.pipeline_mode<synchronous>, transform_indices = @transform_5, window_bounds = array<i64: 8, 1>}, {transform_indices = @transform_6, window_bounds = array<i64: 2, 8, 256>}]} {
    %c0 = arith.constant 0 : index
    %c0_0 = arith.constant 0 : index
    %c0_1 = arith.constant 0 : index
    %0 = vector.load %arg1[%c0, %c0_0, %c0_1] : memref<2x16x256xbf16, #tpu.memory_space<vmem>>, vector<1x16x256xbf16>
    %1 = vector.shape_cast %0 : vector<1x16x256xbf16> to vector<16x256xbf16>
    %c1 = arith.constant 1 : index
    %c0_2 = arith.constant 0 : index
    %c0_3 = arith.constant 0 : index
    %2 = vector.load %arg1[%c1, %c0_2, %c0_3] : memref<2x16x256xbf16, #tpu.memory_space<vmem>>, vector<1x16x256xbf16>
    %3 = vector.shape_cast %2 : vector<1x16x256xbf16> to vector<16x256xbf16>
    %4 = tpu.concatenate %1, %3 in 1 : vector<16x256xbf16>, vector<16x256xbf16> -> vector<16x512xbf16>
    %c0_4 = arith.constant 0 : index
    %c0_5 = arith.constant 0 : index
    %5 = vector.load %arg3[%c0_4, %c0_5] : memref<16x16xbf16, #tpu.memory_space<vmem>>, vector<16x16xbf16>
    %cst = arith.constant dense<0.000000e+00> : vector<16x512xf32>
    %6 = tpu.matmul %5, %4, %cst {dimension_numbers = #tpu.dot_dimension_numbers<[1], [0], [0], [1], [0, 0, 1, 1], [], []>} : vector<16x16xbf16>, vector<16x512xbf16>, vector<16x512xf32> -> vector<16x512xf32>
    %c0_6 = arith.constant 0 : index
    %c0_7 = arith.constant 0 : index
    %7 = vector.load %arg4[%c0_6, %c0_7] : memref<16x1xf32, #tpu.memory_space<vmem>>, vector<16x1xf32>
    %8 = vector.broadcast %7 : vector<16x1xf32> to vector<16x512xf32>
    %9 = arith.addf %6, %8 : vector<16x512xf32>
    %10 = vector.extract_strided_slice %9 {offsets = [0, 0], sizes = [8, 512], strides = [1, 1]} : vector<16x512xf32> to vector<8x512xf32>
    %11 = arith.truncf %10 : vector<8x512xf32> to vector<8x512xbf16>
    %12 = vector.extract_strided_slice %9 {offsets = [8, 0], sizes = [8, 512], strides = [1, 1]} : vector<16x512xf32> to vector<8x512xf32>
    %13 = arith.truncf %12 : vector<8x512xf32> to vector<8x512xbf16>
    %14 = vector.extract_strided_slice %13 {offsets = [0, 0], sizes = [8, 256], strides = [1, 1]} : vector<8x512xbf16> to vector<8x256xbf16>
    %15 = vector.extract_strided_slice %11 {offsets = [0, 0], sizes = [8, 256], strides = [1, 1]} : vector<8x512xbf16> to vector<8x256xbf16>
    %cst_8 = arith.constant dense<0.000000e+00> : vector<8x8xf32>
    %16 = tpu.matmul %14, %15, %cst_8 {dimension_numbers = #tpu.dot_dimension_numbers<[1], [1], [0], [0], [0, 0, 1, 0], [], []>} : vector<8x256xbf16>, vector<8x256xbf16>, vector<8x8xf32> -> vector<8x8xf32>
    %cst_9 = arith.constant dense<0xFF800000> : vector<8xf32>
    %17 = vector.multi_reduction <maximumf>, %16, %cst_9 [1] : vector<8x8xf32> to vector<8xf32>
    %18 = vector.shape_cast %17 : vector<8xf32> to vector<8x1xf32>
    %19 = vector.broadcast %18 : vector<8x1xf32> to vector<8x8xf32>
    %20 = arith.subf %16, %19 : vector<8x8xf32>
    %21 = math.exp %20 : vector<8x8xf32>
    %cst_10 = arith.constant dense<0.000000e+00> : vector<8xf32>
    %22 = vector.multi_reduction <add>, %21, %cst_10 [1] : vector<8x8xf32> to vector<8xf32>
    %23 = vector.shape_cast %22 : vector<8xf32> to vector<8x1xf32>
    %24 = tpu.reciprocal %23 {approx = true} : vector<8x1xf32> -> vector<8x1xf32>
    %25 = vector.broadcast %24 : vector<8x1xf32> to vector<8x8xf32>
    %26 = arith.mulf %21, %25 : vector<8x8xf32>
    %27 = arith.truncf %26 : vector<8x8xf32> to vector<8x8xbf16>
    %c0_11 = arith.constant 0 : index
    %c0_12 = arith.constant 0 : index
    %c0_13 = arith.constant 0 : index
    %28 = vector.load %arg2[%c0_11, %c0_12, %c0_13] : memref<2x8x256xbf16, #tpu.memory_space<vmem>>, vector<1x8x256xbf16>
    %29 = vector.shape_cast %28 : vector<1x8x256xbf16> to vector<8x256xbf16>
    %cst_14 = arith.constant dense<0.000000e+00> : vector<8x256xf32>
    %30 = tpu.matmul %27, %29, %cst_14 {dimension_numbers = #tpu.dot_dimension_numbers<[0], [0], [1], [1], [0, 1, 1, 1], [], []>} : vector<8x8xbf16>, vector<8x256xbf16>, vector<8x256xf32> -> vector<8x256xf32>
    %31 = arith.truncf %30 : vector<8x256xf32> to vector<8x256xbf16>
    %32 = vector.extract_strided_slice %13 {offsets = [0, 256], sizes = [8, 256], strides = [1, 1]} : vector<8x512xbf16> to vector<8x256xbf16>
    %33 = vector.extract_strided_slice %11 {offsets = [0, 256], sizes = [8, 256], strides = [1, 1]} : vector<8x512xbf16> to vector<8x256xbf16>
    %cst_15 = arith.constant dense<0.000000e+00> : vector<8x8xf32>
    %34 = tpu.matmul %32, %33, %cst_15 {dimension_numbers = #tpu.dot_dimension_numbers<[1], [1], [0], [0], [0, 0, 1, 0], [], []>} : vector<8x256xbf16>, vector<8x256xbf16>, vector<8x8xf32> -> vector<8x8xf32>
    %cst_16 = arith.constant dense<0xFF800000> : vector<8xf32>
    %35 = vector.multi_reduction <maximumf>, %34, %cst_16 [1] : vector<8x8xf32> to vector<8xf32>
    %36 = vector.shape_cast %35 : vector<8xf32> to vector<8x1xf32>
    %37 = vector.broadcast %36 : vector<8x1xf32> to vector<8x8xf32>
    %38 = arith.subf %34, %37 : vector<8x8xf32>
    %39 = math.exp %38 : vector<8x8xf32>
    %cst_17 = arith.constant dense<0.000000e+00> : vector<8xf32>
    %40 = vector.multi_reduction <add>, %39, %cst_17 [1] : vector<8x8xf32> to vector<8xf32>
    %41 = vector.shape_cast %40 : vector<8xf32> to vector<8x1xf32>
    %42 = tpu.reciprocal %41 {approx = true} : vector<8x1xf32> -> vector<8x1xf32>
    %43 = vector.broadcast %42 : vector<8x1xf32> to vector<8x8xf32>
    %44 = arith.mulf %39, %43 : vector<8x8xf32>
    %45 = arith.truncf %44 : vector<8x8xf32> to vector<8x8xbf16>
    %c1_18 = arith.constant 1 : index
    %c0_19 = arith.constant 0 : index
    %c0_20 = arith.constant 0 : index
    %46 = vector.load %arg2[%c1_18, %c0_19, %c0_20] : memref<2x8x256xbf16, #tpu.memory_space<vmem>>, vector<1x8x256xbf16>
    %47 = vector.shape_cast %46 : vector<1x8x256xbf16> to vector<8x256xbf16>
    %cst_21 = arith.constant dense<0.000000e+00> : vector<8x256xf32>
    %48 = tpu.matmul %45, %47, %cst_21 {dimension_numbers = #tpu.dot_dimension_numbers<[0], [0], [1], [1], [0, 1, 1, 1], [], []>} : vector<8x8xbf16>, vector<8x256xbf16>, vector<8x256xf32> -> vector<8x256xf32>
    %49 = arith.truncf %48 : vector<8x256xf32> to vector<8x256xbf16>
    %50 = tpu.concatenate %31, %49 in 1 : vector<8x256xbf16>, vector<8x256xbf16> -> vector<8x512xbf16>
    %51 = tpu.concatenate %4, %50 in 0 : vector<16x512xbf16>, vector<8x512xbf16> -> vector<24x512xbf16>
    %c0_22 = arith.constant 0 : index
    %c0_23 = arith.constant 0 : index
    %52 = vector.load %arg5[%c0_22, %c0_23] : memref<8x24xbf16, #tpu.memory_space<vmem>>, vector<8x24xbf16>
    %cst_24 = arith.constant dense<0.000000e+00> : vector<8x512xf32>
    %53 = tpu.matmul %52, %51, %cst_24 {dimension_numbers = #tpu.dot_dimension_numbers<[1], [0], [0], [1], [0, 0, 1, 1], [], []>} : vector<8x24xbf16>, vector<24x512xbf16>, vector<8x512xf32> -> vector<8x512xf32>
    %c0_25 = arith.constant 0 : index
    %c0_26 = arith.constant 0 : index
    %54 = vector.load %arg6[%c0_25, %c0_26] : memref<8x1xf32, #tpu.memory_space<vmem>>, vector<8x1xf32>
    %55 = vector.broadcast %54 : vector<8x1xf32> to vector<8x512xf32>
    %56 = arith.addf %53, %55 : vector<8x512xf32>
    %cst_27 = arith.constant 0.000000e+00 : f32
    %57 = vector.broadcast %cst_27 : f32 to vector<8x512xf32>
    %58 = arith.maximumf %56, %57 : vector<8x512xf32>
    %59 = arith.truncf %58 : vector<8x512xf32> to vector<8x512xbf16>
    %60 = vector.extract_strided_slice %59 {offsets = [0, 0], sizes = [8, 256], strides = [1, 1]} : vector<8x512xbf16> to vector<8x256xbf16>
    %c0_28 = arith.constant 0 : index
    %c0_29 = arith.constant 0 : index
    %c0_30 = arith.constant 0 : index
    %61 = vector.load %arg7[%c0_28, %c0_29, %c0_30] : memref<2x8x256xbf16, #tpu.memory_space<vmem>>, vector<1x8x256xbf16>
    %62 = vector.shape_cast %61 : vector<1x8x256xbf16> to vector<8x256xbf16>
    %63 = vector.shape_cast %60 : vector<8x256xbf16> to vector<1x8x256xbf16>
    tpu.vector_store %arg7[%c0_28, %c0_29, %c0_30], %63 {strides = array<i32>} : memref<2x8x256xbf16, #tpu.memory_space<vmem>>, vector<1x8x256xbf16>,
    %64 = vector.extract_strided_slice %59 {offsets = [0, 256], sizes = [8, 256], strides = [1, 1]} : vector<8x512xbf16> to vector<8x256xbf16>
    %c1_31 = arith.constant 1 : index
    %c0_32 = arith.constant 0 : index
    %c0_33 = arith.constant 0 : index
    %65 = vector.load %arg7[%c1_31, %c0_32, %c0_33] : memref<2x8x256xbf16, #tpu.memory_space<vmem>>, vector<1x8x256xbf16>
    %66 = vector.shape_cast %65 : vector<1x8x256xbf16> to vector<8x256xbf16>
    %67 = vector.shape_cast %64 : vector<8x256xbf16> to vector<1x8x256xbf16>
    tpu.vector_store %arg7[%c1_31, %c0_32, %c0_33], %67 {strides = array<i32>} : memref<2x8x256xbf16, #tpu.memory_space<vmem>>, vector<1x8x256xbf16>,
    return
  }
  func.func @transform_0(%arg0: i32) -> (i32, i32, i32) {
    %c0_i32 = arith.constant 0 : i32
    %c0_i32_0 = arith.constant 0 : i32
    %c0_i32_1 = arith.constant 0 : i32
    return %arg0, %c0_i32, %c0_i32_0 : i32, i32, i32
  }
  func.func @transform_1(%arg0: i32) -> (i32, i32, i32) {
    %c0_i32 = arith.constant 0 : i32
    %c0_i32_0 = arith.constant 0 : i32
    %c0_i32_1 = arith.constant 0 : i32
    return %arg0, %c0_i32, %c0_i32_0 : i32, i32, i32
  }
  func.func @transform_2(%arg0: i32) -> (i32, i32) {
    %c0_i32 = arith.constant 0 : i32
    %c0_i32_0 = arith.constant 0 : i32
    %c0_i32_1 = arith.constant 0 : i32
    return %c0_i32, %c0_i32_0 : i32, i32
  }
  func.func @transform_3(%arg0: i32) -> (i32, i32) {
    %c0_i32 = arith.constant 0 : i32
    %c0_i32_0 = arith.constant 0 : i32
    %c0_i32_1 = arith.constant 0 : i32
    return %c0_i32, %c0_i32_0 : i32, i32
  }
  func.func @transform_4(%arg0: i32) -> (i32, i32) {
    %c0_i32 = arith.constant 0 : i32
    %c0_i32_0 = arith.constant 0 : i32
    %c0_i32_1 = arith.constant 0 : i32
    return %c0_i32, %c0_i32_0 : i32, i32
  }
  func.func @transform_5(%arg0: i32) -> (i32, i32) {
    %c0_i32 = arith.constant 0 : i32
    %c0_i32_0 = arith.constant 0 : i32
    %c0_i32_1 = arith.constant 0 : i32
    return %c0_i32, %c0_i32_0 : i32, i32
  }
  func.func @transform_6(%arg0: i32) -> (i32, i32, i32) {
    %c0_i32 = arith.constant 0 : i32
    %c0_i32_0 = arith.constant 0 : i32
    %c0_i32_1 = arith.constant 0 : i32
    return %arg0, %c0_i32, %c0_i32_0 : i32, i32, i32
  }
}

</mosaic_0001>

<bundles_post_ra>
// kernel: tpu_custom_call.1
= control target key start
LH: loop header
LB: loop body
LE: loop exit
PB: predicated region body
PF: predicated region fallthrough
CT: control target
= control target key end

     0   :  { %s1529_s0 = inlined_call_operand.hbm [shape: bf16[4,16,256], index: 0, kind: input, shape index: {}]   ;;  %s1530_s1 = inlined_call_operand.hbm [shape: bf16[4,8,256], index: 1, kind: input, shape index: {}]   ;;  %s1531_s2 = inlined_call_operand.vmem [shape: bf16[16,16], index: 2, kind: input, shape index: {}]   ;;  %s1532_s3 = inlined_call_operand.vmem [shape: f32[16,1], index: 3, kind: input, shape index: {}]   ;;  %s1533_s4 = inlined_call_operand.vmem [shape: bf16[8,24], index: 4, kind: input, shape index: {}]   ;;  %s1534_s5 = inlined_call_operand.vmem [shape: f32[8,1], index: 5, kind: input, shape index: {}]   ;;  %s1535_s6 = inlined_call_operand.hbm [shape: bf16[4,8,256], index: 6, kind: output, shape index: {}]  }
   0x1   :  { %1538 = sst [smem:[#allocation11_spill]] %s1529_s0 }
   0x2   :  { %11 = vsyncpa [#allocation3], 0 }
   0x3   :  { %13 = vsyncpa [#allocation3 + $0x1], 0 }
   0x4   :  { %14 = vsyncpa [#allocation6], 0 }
   0x5   :  { %16 = vsyncpa [#allocation6 + $0x1], 0 }
   0x6   :  { %17 = vsyncpa [#allocation4], 0 }
   0x7   :  { %19 = vsyncpa [#allocation4 + $0x1], 0  ;;  %s1258_s21 = smov 0   ;;  %s1260_s22 = smov 0  }
   0x8   :  { %s1262_s23 = smov 0   ;;  %s1264_s24 = smov 0  }
   0x9 LB: > { %s1279_s25 = sadd.s32 4294967295, %s1213_s24   ;;  %s952_s26 = sadd.s32 4294967294, %s1213_s24   ;;  %s1213_s24 = sphi %s1264_s24, %s1553_s24   ;;  %s1209_s23 = sphi %s1262_s23, %s1552_s23   ;;  %s1205_s22 = sphi %s1260_s22, %s1551_s22   ;;  %s1201_s21 = sphi %s1258_s21, %s1550_s21  }
   0xa   : > { %s1283_s27 = sadd.s32 1, %s1213_s24   ;;  %s32_s28 = sadd.s32 1, %s1209_s23 }
   0xb   : > { %s29_s29 = ssub.s32 %s1213_s24, %s1283_s27  ;;  %p39_p0 = scmp.ne.s32.totalorder %s1209_s23, %s1205_s22 }
   0xc   : > { %p30_p1 = scmp.eq.s32.totalorder %s29_s29, 0  ;;  %p40_p2 = scmp.eq.s32.totalorder %s1213_s24, 0 }
   0xd   : > { %p45_p3 = scmp.ne.s32.totalorder %s1205_s22, %s1201_s21  ;;  %p46_p4 = scmp.eq.s32.totalorder %s1279_s25, 0 }
   0xe   : > { %s1295_s30 = scalar_select %p30_p1, %s1209_s23, %s32_s28  }
   0xf   : > { %p1297_p5 = por %p40_p2, %p39_p0  ;;  %p1301_p6 = por %p46_p4, %p45_p3 }
  0x10   : > { %p179_p7 = scmp.eq.s32.totalorder %s1279_s25, 1  ;;  %p185_p8 = scmp.eq.s32.totalorder %s952_s26, 1 }
  0x11   : > { %s1540_s8 = scalar_select %p1301_p6, 1, 0 }
  0x12   : > { %p1023_p10 = scmp.lt.s32.totalorder %s1213_s24, 2  ;;  %p1308_p11 = por %p179_p7, %p39_p0 }
  0x13   : > { %p1312_p12 = por %p185_p8, %p45_p3  ;;  %s1317_s11 = sand.u32 1, %s1209_s23  }
  0x14   : > { %s1541_s9 = scalar_select %p1308_p11, 1, 0 }
  0x15   : > { %s1542_s10 = scalar_select %p1312_p12, 1, 0 }
  0x16   : > { %s999_s12 = sshll.u32 %s1213_s24, 9  ;;  %s955_s13 = sshll.u32 %s1317_s11, 5 }
  0x17   : > { %s1543_s0 = sld [smem:[#allocation11_spill]]  ;;  %s221_s17 = scalar_lea.vmem [#allocation2], %s955_s13 }
  0x18   : > { %s229_s18 = sshll.u32 %s221_s17, 4  ;;  %p1328_p13 = pnand %p1023_p10, %p1297_p5  ;;  %s1332_s18 = int_to_ptr.vmem [resolvable:$true] %s229_s18 }
  0x19   : > { %s218_s20 = scalar_lea.sflag [#allocation3], %s1317_s11 }
  0x1a   : > { %p1085_p1 = pneg %p1328_p13 }
  0x1d   : > { %s1324_s16 = scalar_lea.hbm %s1543_s0, %s999_s12  ;;  %s1088_s7 = scalar_lea.hbm %s1543_s0, 1024 }
  0x1e   : > { %s1083_s26 = scalar_lea.hbm %s1324_s16, 512  ;;  %p1089_p4 = scmp.lt.u32.totalorder %s1324_s16, %s1543_s0 }
  0x1f   : > { %p1084_p0 = scmp.ne.s32.totalorder %s1324_s16, %s1083_s26  ;;  %p1090_p5 = scmp.lt.u32.totalorder %s1088_s7, %s1083_s26 }
  0x20   : > { %p1092_p8 = scmp.lt.u32.totalorder %s1083_s26, %s1324_s16 }
  0x21   : > { %p1086_p2 = pnand %p1085_p1, %p1084_p0  ;;  %p1091_p7 = por %p1090_p5, %p1089_p4 }
  0x23   : > { %p1087_p3 = pneg %p1086_p2  ;;  %p1093_p10 = por %p1092_p8, %p1091_p7 }
  0x25   : > { %p1094_p9 = pnand %p1093_p10, %p1087_p3 }
  0x27   : > { %1097 = shalt.err (!%p1094_p9)
}
  0x28   : > { %s1098_s14 = scalar_lea.vmem %s1332_s18, 512  ;;  %s1215_s15 = smov [#allocation2]  }
  0x29   : > { %p1099_p0 = scmp.ne.s32.totalorder %s1332_s18, %s1098_s14  ;;  %s1103_s17 = sshll.u32 %s1215_s15, 4  ;;  %s1104_s17 = int_to_ptr.vmem [resolvable:$false] %s1103_s17 }
  0x2a   : > { %s1105_s28 = scalar_lea.vmem %s1104_s17, 1024  ;;  %p1106_p11 = scmp.lt.s32.totalorder %s1332_s18, %s1104_s17 }
  0x2b   : > { %p1101_p2 = pnand %p1099_p0, %p1085_p1  ;;  %p1107_p4 = scmp.lt.s32.totalorder %s1105_s28, %s1098_s14 }
  0x2d   : > { %p1102_p12 = pneg %p1101_p2  ;;  %p1108_p5 = por %p1107_p4, %p1106_p11 }
  0x2f   : > { %p1109_p7 = pnand %p1108_p5, %p1102_p12 }
  0x31   : > { %1112 = shalt.err (!%p1109_p7)
}
  0x32   : > { %s1216_s26 = smov 128   ;;  %s1217_s29 = smov 8  }
  0x33   : > { %1015 = dma.hbm_to_vmem [thread:$0]  (!%p1328_p13), %s1324_s16, 512, %s1332_s18, %s218_s20, %s1216_s26, %s1216_s26, %s1217_s29  }
  0x34   : > { %p963_p9 = scmp.ge.s32.totalorder %s1213_s24, 1  ;;  %p259_p11 = scmp.lt.s32.totalorder %s1213_s24, 3 }
  0x35   : > { %s959_s7 = sshll.u32 %s1317_s11, 4  ;;  %s1001_s13 = sshll.u32 %s1213_s24, 8 }
  0x36   : > { %p1368_p12 = pnand %p963_p9, %p259_p11  ;;  %s243_s14 = scalar_lea.vmem [#allocation5], %s959_s7 }
  0x37   : > { %s251_s15 = sshll.u32 %s243_s14, 4  ;;  %s1376_s0 = scalar_lea.hbm %s1530_s1, %s1001_s13  ;;  %s1378_s15 = int_to_ptr.vmem [resolvable:$true] %s251_s15 }
  0x38   : > { %s240_s16 = scalar_lea.sflag [#allocation6], %s1317_s11  ;;  %s1113_s18 = scalar_lea.hbm %s1376_s0, 256 }
  0x39   : > { %p1114_p3 = scmp.ne.s32.totalorder %s1376_s0, %s1113_s18  ;;  %s1118_s14 = scalar_lea.hbm %s1530_s1, 512 }
  0x3a   : > { %p1119_p0 = scmp.lt.u32.totalorder %s1376_s0, %s1530_s1  ;;  %p1120_p2 = scmp.lt.u32.totalorder %s1118_s14, %s1113_s18 }
  0x3b   : > { %p1116_p8 = pnand %p1114_p3, %p1085_p1  ;;  %p1122_p5 = scmp.lt.u32.totalorder %s1113_s18, %s1376_s0 }
  0x3c   : > { %p1121_p4 = por %p1120_p2, %p1119_p0 }
  0x3d   : > { %p1117_p10 = pneg %p1116_p8 }
  0x3e   : > { %p1123_p7 = por %p1122_p5, %p1121_p4 }
  0x40   : > { %p1124_p9 = pnand %p1123_p7, %p1117_p10 }
  0x42   : > { %1127 = shalt.err (!%p1124_p9)
}
  0x43   : > { %s1128_s28 = scalar_lea.vmem %s1378_s15, 256  ;;  %s1218_s20 = smov [#allocation5]  }
  0x44   : > { %p1129_p11 = scmp.ne.s32.totalorder %s1378_s15, %s1128_s28  ;;  %s1133_s7 = sshll.u32 %s1218_s20, 4  ;;  %s1134_s7 = int_to_ptr.vmem [resolvable:$false] %s1133_s7 }
  0x45   : > { %s1135_s17 = scalar_lea.vmem %s1134_s7, 512  ;;  %p1136_p6 = scmp.lt.s32.totalorder %s1378_s15, %s1134_s7 }
  0x46   : > { %p1131_p3 = pnand %p1129_p11, %p1085_p1  ;;  %p1137_p0 = scmp.lt.s32.totalorder %s1135_s17, %s1128_s28 }
  0x48   : > { %p1132_p8 = pneg %p1131_p3  ;;  %p1138_p2 = por %p1137_p0, %p1136_p6 }
  0x4a   : > { %p1139_p4 = pnand %p1138_p2, %p1132_p8 }
  0x4c   : > { %1142 = shalt.err (!%p1139_p4)
}
  0x4d   : > { %1018 = dma.hbm_to_vmem [thread:$0]  (!%p1328_p13), %s1376_s0, 256, %s1378_s15, %s240_s16, %s1216_s26, %s1216_s26, %s1217_s29  }
  0x4e   : > { %263 = sbr.rel (%p1368_p12) target bundleno = 1412 (0x584), region = 44  ;;  %s1412_s18 = sand.u32 (!%p1368_p12), 1, %s1205_s22  }
  0x4f   : > { %s964_s14 = sshll.u32 (!%p1368_p12), %s1412_s18, 5  ;;  %s266_s13 = scalar_lea.sflag (!%p1368_p12), [#allocation3], %s1412_s18 }
  0x50   : > { %s269_s19 = scalar_lea.vmem (!%p1368_p12), [#allocation2], %s964_s14  ;;  %p1546_p6 = scmp.ne.s32.totalorder (!%p1368_p12), %s1540_s8, 0 }
  0x55   : > { %1188 = dma.done.wait (%p1546_p6), %s266_s13, 512  }
  0x56   : > { %1190 = vsyncadd (%p1546_p6), %s266_s13, 4294966784  ;;  %s965_s0 = sshll.u32 %s1412_s18, 4  ;;  %s275_s11 = scalar_lea.sflag [#allocation6], %s1412_s18 }
  0x57   : > { %s1424_s26 = scalar_lea.vmem [#allocation5], %s965_s0 }
  0x58   : > { %1192 = dma.done.wait (%p1546_p6), %s275_s11, 256  }
  0x59   : > { %1194 = vsyncadd (%p1546_p6), %s275_s11, 4294967040  ;;  %v1219_v0 = vmov 0   ;;  %v1064_v1 = vld [vmem:[%s269_s19 + $0x4] ss:$8 sps:$4 sm:$0xff]   ;;  %v1433_v2 = vld [vmem:[%s269_s19 + $0x14] ss:$8 sps:$4 sm:$0xff]  }
  0x5a   : > { %396 = vmatprep.mubr.bf16.mxu0 %v1219_v0  ;;  %439 = vmatprep.mubr.bf16.mxu1 %v1219_v0  ;;  %v1068_v3 = vld [vmem:[%s269_s19] ss:$8 sps:$4 sm:$0xff]   ;;  %v1435_v4 = vld [vmem:[%s269_s19 + $0x10] ss:$8 sps:$4 sm:$0xff]   ;;  %vm360_vm0 = vcmask 130048   ;;  %vm498_vm1 = vcmask 64512  }
  0x5b   : > { %1062 = vset.pattern.permute.xlu0 %v1219_v0  ;;  %364 = vmatprep.subr.bf16.mxu0 %v1064_v1  ;;  %v1070_v5 = vld [vmem:[%s1531_s2] sm:$0xff]   ;;  %v344_v7 = vld [vmem:[%s1532_s3 + $0x8] sm:$0xff]  ;;  %vm536_vm2 = vcmask 1043456   ;;  %vm720_vm3 = vcmask 195584   ;;  %s311_s13 = scalar_lea.vmem [#allocation7], %s965_s0  ;;  %s1005_s11 = sshll.u32 %s1279_s25, 8 }
  0x5c   : > { %407 = vmatprep.subr.bf16.mxu1 %v1433_v2  ;;  %v343_v6 = vld [vmem:[%s1532_s3] sm:$0xff]  ;;  %365 = vmatpush1.bf16.msra.mxu0 %v1068_v3  ;;  %v980_v58 = vld [vmem:[%s1424_s26 + $0x8] sm:$0xff]  ;;  %s856_s19 = sshll.u32 %s311_s13, 4  ;;  %s1485_s0 = scalar_lea.hbm %s1535_s6, %s1005_s11  ;;  %s1480_s19 = int_to_ptr.vmem [resolvable:$true] %s856_s19 }
  0x5d   : > { %408 = vmatpush1.bf16.msra.mxu1 %v1435_v4  ;;  %347 = vperm.xlu0 %1062, %v343_v6   ;;  %v511_v54 = vld [vmem:[%s1424_s26] sm:$0xff]  ;;  %v982_v59 = vcombine.high %v980_v58, %v980_v58  ;;  %s842_s12 = scalar_lea.sflag [#allocation4], %s1412_s18  ;;  %s1143_s8 = scalar_lea.vmem %s1480_s19, 256 }
  0x5e   : > { %v977_v55 = vcombine.high %v511_v54, %v511_v54  ;;  %v976_v56 = vcombine.low %v511_v54, %v511_v54  ;;  %p1144_p13 = scmp.ne.s32.totalorder %s1480_s19, %s1143_s8  ;;  %p1547_p1 = scmp.ne.s32.totalorder %s1541_s9, 0 }
  0x5f   : > { %974 = vmatmul.mubr.msk.bf16.vlgmr.msra.gmra.mrb[0].mxu0 %vm360_vm0, %v1070_v5  ;;  %s1220_s25 = smov [#allocation7]  }
  0x60   : > { %975 = vmatmul.mubr.msk.bf16.vlgmr.msra.gmra.mrb[0].mxu1 %vm360_vm0, %v1070_v5  ;;  %978 = vmatprep.subr.msk.bf16.mxu1 %vm536_vm2, %v977_v55  ;;  %v538_v57 = vsel %vm536_vm2, %v976_v56, 0  ;;  %p1145_p12 = pnand %p1144_p13, %p1547_p1  ;;  %s1147_s15 = sshll.u32 %s1220_s25, 4  ;;  %s1148_s15 = int_to_ptr.vmem [resolvable:$false] %s1147_s15 }
  0x61   : > { %575 = vmatprep.mubr.bf16.mxu1 %v1219_v0  ;;  %352 = vperm.xlu0 %1062, %v344_v7   ;;  %v981_v7 = vcombine.low %v980_v58, %v980_v58  ;;  %s1149_s16 = scalar_lea.vmem %s1148_s15, 512  ;;  %p1150_p5 = scmp.lt.s32.totalorder %s1480_s19, %s1148_s15 }
  0x62   : > { %544 = vmatpush1.bf16.msra.mxu1 %v538_v57  ;;  %p1146_p10 = pneg %p1145_p12  ;;  %p1151_p7 = scmp.lt.s32.totalorder %s1149_s16, %s1143_s8 }
  0x63   : > { %983 = vmatprep.subr.msk.bf16.mxu1 %vm536_vm2, %v982_v59 }
  0x64   : > { %p1152_p9 = por %p1151_p7, %p1150_p5 }
  0x66   : > { %p1153_p11 = pnand %p1152_p9, %p1146_p10 }
  0xdc   : > { %v348_v8 = vpop.permute.xlu0 %347 }
  0xe0   : > { %v353_v9 = vpop.permute.xlu0 %352 }
 0x132   : > { %v398_v10 = vpop.f32.mrb[0].mxu0 }
 0x133   : > { %v441_v11 = vpop.f32.mrb[0].mxu1  ;;  %v399_v12 = vadd.f32 %v398_v10, %v348_v8  ;;  %v400_v13 = vpop.f32.mrb[1].mxu0 }
 0x134   : > { %v443_v14 = vpop.f32.mrb[1].mxu1  ;;  %v401_v15 = vadd.f32 %v400_v13, %v348_v8  ;;  %v402_v17 = vpop.f32.mrb[2].mxu0  ;;  %v442_v27 = vadd.f32 %v441_v11, %v348_v8  ;;  %v714_v11 = vld [vmem:[%s1534_s5] sm:$0xff] }
 0x135   : > { %v444_v16 = vadd.f32 %v443_v14, %v348_v8  ;;  %v445_v18 = vpop.f32.mrb[2].mxu1  ;;  %v404_v19 = vpop.f32.mrb[3].mxu0  ;;  %v450_v23 = vpack.c.bf16 %v399_v12, %v399_v12  ;;  %v403_v26 = vadd.f32 %v402_v17, %v353_v9  ;;  %v665_v8 = vsel %vm536_vm2, %v981_v7, 0 }
 0x136   : > { %v447_v20 = vpop.f32.mrb[3].mxu1  ;;  %v451_v21 = vpack.c.bf16 %v401_v15, %v401_v15  ;;  %v405_v22 = vadd.f32 %v404_v19, %v353_v9  ;;  %v452_v30 = vpack.c.bf16 %v442_v27, %v442_v27  ;;  %v446_v32 = vadd.f32 %v445_v18, %v353_v9 }
 0x137   : > { %v453_v24 = vpack.c.bf16 %v444_v16, %v444_v16  ;;  %v448_v28 = vadd.f32 %v447_v20, %v353_v9  ;;  %v454_v29 = vpack.c.bf16 %v403_v26, %v403_v26 }
 0x138   : > { %v455_v25 = vpack.c.bf16 %v405_v22, %v405_v22  ;;  %458 = vmatprep.subr.bf16.mxu0 %v451_v21  ;;  %v456_v33 = vpack.c.bf16 %v446_v32, %v446_v32 }
 0x139   : > { %459 = vmatpush1.bf16.xpose.msra.mxu0 %v450_v23  ;;  %v457_v31 = vpack.c.bf16 %v448_v28, %v448_v28 }
 0x13a   : > { %490 = vmatprep.mubr.bf16.mxu0 %v455_v25  ;;  %586 = vmatprep.subr.bf16.mxu0 %v453_v24 }
 0x140   : > { %491 = vmatmul.mubr.bf16.vlgmr.msra.gmra.mrb[4].mxu0 %v454_v29 }
 0x141   : > { %587 = vmatpush1.bf16.xpose.msra.mxu0 %v452_v30  ;;  %618 = vmatprep.mubr.bf16.mxu0 %v457_v31 }
 0x142   : > { %736 = vmatprep.subr.bf16.mxu0 %v1064_v1 }
 0x148   : > { %619 = vmatmul.mubr.bf16.vlgmr.msra.gmra.mrb[8].mxu0 %v456_v33 }
 0x149   : > { %737 = vmatpush1.bf16.msra.mxu0 %v1068_v3  ;;  %768 = vmatprep.mubr.bf16.mxu0 %v1219_v0 }
 0x213   : > { %v492_v34 = vpop.f32.mrb[4].mxu0 }
 0x214   : > { %v494_v35 = vpop.f32.mrb[5].mxu0  ;;  %v499_v36 = vsel %vm498_vm1, %v492_v34, -inf }
 0x215   : > { %500 = vmax.xlane.f32.xlu1 %v499_v36  ;;  %v495_v37 = vpop.f32.mrb[6].mxu0 }
 0x216   : > { %v496_v38 = vpop.f32.mrb[7].mxu0 }
 0x21b   : > { %v620_v39 = vpop.f32.mrb[8].mxu0 }
 0x21c   : > { %v622_v40 = vpop.f32.mrb[9].mxu0  ;;  %v626_v41 = vsel %vm498_vm1, %v620_v39, -inf }
 0x21d   : > { %627 = vmax.xlane.f32.xlu1 %v626_v41  ;;  %v623_v42 = vpop.f32.mrb[10].mxu0 }
 0x21e   : > { %v624_v43 = vpop.f32.mrb[11].mxu0 }
 0x2a2   : > { %v501_v44 = vpop.xlane.xlu1 %500 }
 0x2a3   : > { %v502_v45 = vsub.f32 %v492_v34, %v501_v44 }
 0x2a5   : > { %v503_v46 = vmul.f32 1.442695, %v502_v45 }
 0x2a7   : > { %1075 = vpow2.f32 %v503_v46 }
 0x2aa   : > { %v628_v47 = vpop.xlane.xlu1 %627 }
 0x2ab   : > { %v629_v48 = vsub.f32 %v620_v39, %v628_v47 }
 0x2ad   : > { %v630_v49 = vmul.f32 1.442695, %v629_v48 }
 0x2af   : > { %1077 = vpow2.f32 %v630_v49 }
 0x2b1   : > { %v1076_v50 = vpop.eup %1075 }
 0x2b2   : > { %v505_v51 = vsel %vm498_vm1, %v1076_v50, 0.0 }
 0x2b3   : > { %506 = vadd.xlane.f32.xlu0 %v505_v51 }
 0x2b9   : > { %v1078_v52 = vpop.eup %1077 }
 0x2ba   : > { %v632_v53 = vsel %vm498_vm1, %v1078_v52, 0.0 }
 0x2bb   : > { %633 = vadd.xlane.f32.xlu1 %v632_v53 }
 0x340   : > { %v507_v60 = vpop.xlane.xlu0 %506 }
 0x341   : > { %1079 = vrcp.f32 %v507_v60 }
 0x348   : > { %v634_v61 = vpop.xlane.xlu1 %633 }
 0x349   : > { %1081 = vrcp.f32 %v634_v61 }
 0x34b   : > { %v1080_v62 = vpop.eup %1079 }
 0x34c   : > { %v509_v63 = vmul.f32 %v1080_v62, %v1076_v50 }
 0x34e   : > { %v510_v1 = vpack.c.bf16 %v509_v63, %v509_v63 }
 0x350   : > { %512 = vxpose.xlu1.c.b16.start.end [1/1] (short) (narrow) %v510_v1, 16 }
 0x353   : > { %v1082_v3 = vpop.eup %1081 }
 0x354   : > { %v636_v5 = vmul.f32 %v1082_v3, %v1078_v52  ;;  %1063 = vset.pattern.permute.xlu1 %v1219_v0 }
 0x355   : > { %717 = vperm.xlu1 %1063, %v714_v11  }
 0x356   : > { %v637_v6 = vpack.c.bf16 %v636_v5, %v636_v5 }
 0x358   : > { %640 = vxpose.xlu0.c.b16.start.end [1/1] (short) (narrow) %v637_v6, 16 }
 0x3b6   : > { %v520_v9 = vpop.trf.xlu1 }
 0x3b7   : > { %979 = vmatmul.mubr.msk.bf16.vlgmr.msra.gmra.mrb[4].mxu1 %vm498_vm1, %v520_v9 }
 0x3b8   : > { %671 = vmatpush1.bf16.msra.mxu1 %v665_v8  ;;  %702 = vmatprep.mubr.bf16.mxu1 %v1219_v0 }
 0x3b9   : > { %777 = vmatprep.subr.bf16.mxu1 %v1433_v2 }
 0x3be   : > { %v648_v10 = vpop.trf.xlu0 }
 0x3bf   : > { %984 = vmatmul.mubr.msk.bf16.vlgmr.msra.gmra.mrb[8].mxu1 %vm498_vm1, %v648_v10 }
 0x3c0   : > { %778 = vmatpush1.bf16.msra.mxu1 %v1435_v4  ;;  %809 = vmatprep.mubr.bf16.mxu1 %v1219_v0  ;;  %v713_v0 = vld [vmem:[%s1533_s4] sm:$0xf] }
 0x3d4   : > { %v718_v24 = vpop.permute.xlu1 %717 }
 0x48a   : > { %v577_v12 = vpop.f32.mrb[4].mxu1 }
 0x48b   : > { %v584_v13 = vpack.c.bf16 %v577_v12, %v577_v12  ;;  %v579_v14 = vpop.f32.mrb[5].mxu1 }
 0x48c   : > { %v585_v15 = vpack.c.bf16 %v579_v14, %v579_v14  ;;  %v581_v16 = vpop.f32.mrb[6].mxu1 }
 0x48d   : > { %v725_v17 = vsel %vm536_vm2, %v584_v13, 0  ;;  %v582_v2 = vpop.f32.mrb[7].mxu1 }
 0x48e   : > { %985 = vmatprep.subr.msk.bf16.mxu0 %vm536_vm2, %v585_v15 }
 0x48f   : > { %739 = vmatpush1.bf16.msra.mxu0 %v725_v17 }
 0x492   : > { %v704_v4 = vpop.f32.mrb[8].mxu1  ;;  %986 = vmatmul.mubr.msk.bf16.vlgmr.msra.gmra.mrb[12].mxu0 %vm720_vm3, %v713_v0 }
 0x493   : > { %v711_v18 = vpack.c.bf16 %v704_v4, %v704_v4  ;;  %v706_v19 = vpop.f32.mrb[9].mxu1 }
 0x494   : > { %v712_v20 = vpack.c.bf16 %v706_v19, %v706_v19  ;;  %v708_v21 = vpop.f32.mrb[10].mxu1 }
 0x495   : > { %v731_v22 = vsel %vm536_vm2, %v711_v18, 0  ;;  %v709_v23 = vpop.f32.mrb[11].mxu1 }
 0x496   : > { %987 = vmatprep.subr.msk.bf16.mxu1 %vm536_vm2, %v712_v20 }
 0x497   : > { %780 = vmatpush1.bf16.msra.mxu1 %v731_v22 }
 0x49a   : > { %988 = vmatmul.mubr.msk.bf16.vlgmr.msra.gmra.mrb[12].mxu1 %vm720_vm3, %v713_v0 }
 0x565   : > { %v770_v25 = vpop.f32.mrb[12].mxu0 }
 0x566   : > { %v772_v26 = vpop.f32.mrb[13].mxu0  ;;  %v771_v27 = vadd.f32 %v770_v25, %v718_v24 }
 0x567   : > { %v774_v28 = vpop.f32.mrb[14].mxu0  ;;  %v773_v29 = vadd.f32 %v772_v26, %v718_v24 }
 0x568   : > { %v818_v30 = vmax.f32 %v771_v27, 0.0  ;;  %v775_v31 = vpop.f32.mrb[15].mxu0 }
 0x569   : > { %v819_v32 = vmax.f32 %v773_v29, 0.0 }
 0x56b   : > { %v1002_v33 = vpack.c.bf16 %v819_v32, %v818_v30 }
 0x56d   : > { %v811_v34 = vpop.f32.mrb[12].mxu1  ;;  %832 = vst [vmem:[%s311_s13] sm:$0xff] %v1002_v33 }
 0x56e   : > { %v813_v35 = vpop.f32.mrb[13].mxu1  ;;  %v812_v36 = vadd.f32 %v811_v34, %v718_v24 }
 0x56f   : > { %v814_v37 = vadd.f32 %v813_v35, %v718_v24  ;;  %v815_v38 = vpop.f32.mrb[14].mxu1 }
 0x570   : > { %v820_v39 = vmax.f32 %v812_v36, 0.0  ;;  %v816_v40 = vpop.f32.mrb[15].mxu1 }
 0x571   : > { %v821_v41 = vmax.f32 %v814_v37, 0.0 }
 0x573   : > { %v1003_v42 = vpack.c.bf16 %v821_v41, %v820_v39 }
 0x575   : > { %991 = vst [vmem:[%s311_s13 + $0x8] sm:$0xff] %v1003_v42 }
 0x576   : > { %1156 = shalt.err (!%p1153_p11)
}
 0x577   : > { %s1157_s28 = scalar_lea.hbm %s1485_s0, 256  ;;  %s1161_s17 = scalar_lea.hbm %s1535_s6, 512 }
 0x578   : > { %p1158_p3 = scmp.ne.s32.totalorder %s1485_s0, %s1157_s28  ;;  %p1162_p2 = scmp.lt.u32.totalorder %s1485_s0, %s1535_s6 }
 0x579   : > { %p1163_p4 = scmp.lt.u32.totalorder %s1161_s17, %s1157_s28  ;;  %p1165_p13 = scmp.lt.u32.totalorder %s1157_s28, %s1485_s0 }
 0x57a   : > { %p1159_p8 = pnand %p1158_p3, %p1547_p1 }
 0x57b   : > { %p1164_p6 = por %p1163_p4, %p1162_p2 }
 0x57c   : > { %p1160_p0 = pneg %p1159_p8 }
 0x57d   : > { %p1166_p12 = por %p1165_p13, %p1164_p6 }
 0x57f   : > { %p1167_p10 = pnand %p1166_p12, %p1160_p0 }
 0x581   : > { %1170 = shalt.err (!%p1167_p10)
}
 0x582   : > { %s1221_s11 = smov 128   ;;  %s1222_s26 = smov 8  }
 0x583   : > { %1010 = dma.vmem_to_hbm [thread:$0]  (%p1547_p1), %s1480_s19, 256, %s1485_s0, %s842_s12, %s1221_s11, %s1221_s11, %s1222_s26  }
 0x584 PF: > { %s871_s29 = sand.u32 1, %s1201_s21   ;;  %p1548_p5 = scmp.ne.s32.totalorder %s1542_s10, 0 }
 0x585   : > { %p1549_p7 = scmp.ge.s32.totalorder %s1213_s24, 2  ;;  %s872_s8 = scalar_lea.sflag [#allocation4], %s871_s29 }
 0x587   : > { %p1020_p9 = pnand %p1549_p7, %p1548_p5 }
 0x589   : > { %1196 = dma.done.wait (!%p1020_p9), %s872_s8, 256  }
 0x58a   : > { %1198 = vsyncadd (!%p1020_p9), %s872_s8, 4294967040  ;;  %p22_p11 = scmp.ge.s32.totalorder %s1283_s27, 4   ;;  %s1550_s21 = smov %s1205_s22 }
 0x58b   : > { %s1551_s22 = smov %s1209_s23  ;;  %s1552_s23 = smov %s1295_s30 }
 0x58c   : > { %s1553_s24 = smov %s1283_s27  ;;  %24 = sbr.rel (!%p22_p11) target bundleno = 9 (0x9), region = 105 }
 0x593   :  { %877 = vsyncpa [#allocation3], 1 }
 0x594   :  { %879 = vsyncpa [#allocation3 + $0x1], 1 }
 0x595   :  { %880 = vsyncpa [#allocation6], 1 }
 0x596   :  { %882 = vsyncpa [#allocation6 + $0x1], 1 }
 0x597   :  { %883 = vsyncpa [#allocation4], 1 }
 0x598   :  { %885 = vsyncpa [#allocation4 + $0x1], 1 }

</bundles_post_ra>
